<compile_context>
chip_gen: v6e
topology: v6e:2x2x1
jax: 0.10.0
libtpu: 0.0.40
codegen_flags: <defaults>
</compile_context>

<pallas_src>
import numpy as np
import jax
import jax.numpy as jnp
from jax.experimental import pallas as pl
from jax.experimental.pallas import tpu as pltpu


def _rope_rotation_kernel(x_ref, p1_ref, p2_ref, t1_ref, t2_ref, o_ref):
    # x_ref:  (1, ts, bk)  one batch element, ts sequence rows, one head-group block
    # p1_ref: (bk, bk)     bf16 block-diag "even" rotation columns (same for every block)
    # p2_ref: (bk, bk)     bf16 block-diag "odd"  rotation columns
    # t1_ref: (ts, bk)     f32 per-seq-row trig [cos | sin] tiled over heads-in-block
    # t2_ref: (ts, bk)     f32 per-seq-row trig [-sin | cos]
    x = x_ref[0].astype(jnp.bfloat16)                                   # (ts, bk)
    y1 = jnp.dot(x, p1_ref[...], preferred_element_type=jnp.float32)   # x1 per head
    y2 = jnp.dot(x, p2_ref[...], preferred_element_type=jnp.float32)   # x2 per head
    o_ref[0] = (y1 * t1_ref[...] + y2 * t2_ref[...]).astype(o_ref.dtype)


def _choose_head_block(n_state, n_head, h_dim, target=256):
    """Largest bk = hpb*h_dim <= target with hpb | n_head and bk 128-aligned (or == n_state)."""
    candidates = []
    for hpb in range(1, n_head + 1):
        if n_head % hpb:
            continue
        bk = hpb * h_dim
        if bk == n_state or bk % 128 == 0:
            candidates.append(bk)
    fits = [c for c in candidates if c <= target]
    return max(fits) if fits else min(candidates)  # hpb=n_head (bk=n_state) always legal


def _vmem_capacity_bytes():
    try:
        return int(pltpu.get_tpu_info().vmem_capacity_bytes)
    except Exception:
        return 64 << 20  # conservative (v7x per-TC physical VMEM)


def rotary_embedding_with_rotation(x, rotation_matrix, inv_freq, n_head):
    """x: (B, S, n_state) float32. Returns (B, S, n_state) in x.dtype."""
    B, S, n_state = x.shape
    h_dim = n_state // n_head
    half = h_dim // 2

    # ---- head-block width ------------------------------------------------------
    bk = _choose_head_block(n_state, n_head, h_dim)
    hpb = bk // h_dim              # heads per block
    n_h = n_state // bk            # head-block grid extent

    # ---- fold learned rotation + even/odd de-interleave into (bk, bk) blocks ----
    # Output column c = h*h_dim + p. For p < half it needs x1[h, p] = (x_h @ R)[2p];
    # for p >= half it needs x1[h, p-half]; similarly x2 uses the odd columns of R.
    p_idx = jnp.arange(h_dim)
    f_idx = jnp.where(p_idx < half, p_idx, p_idx - half)               # (h_dim,)
    p1_head = rotation_matrix[:, 2 * f_idx]                            # (h_dim, h_dim)
    p2_head = rotation_matrix[:, 2 * f_idx + 1]                        # (h_dim, h_dim)
    eye_hpb = jnp.eye(hpb, dtype=rotation_matrix.dtype)
    P1 = jnp.kron(eye_hpb, p1_head).astype(jnp.bfloat16)               # (bk, bk)
    P2 = jnp.kron(eye_hpb, p2_head).astype(jnp.bfloat16)               # (bk, bk)

    # ---- trig tables: only (S, bk), shared across all head blocks (f32) ---------
    pos = jnp.arange(S, dtype=jnp.float32)
    ang = pos[:, None] * inv_freq[None, :].astype(jnp.float32)         # (S, half)
    sin, cos = jnp.sin(ang), jnp.cos(ang)
    T1 = jnp.tile(jnp.concatenate([cos, sin], axis=-1), (1, hpb))      # (S, bk)
    T2 = jnp.tile(jnp.concatenate([-sin, cos], axis=-1), (1, hpb))     # (S, bk)

    # ---- generation-aware VMEM budget -> seq tile --------------------------------
    vmem_cap = _vmem_capacity_bytes()                       # 128 MiB v5e/v6e, 64 MiB v7x
    vmem_budget = min(int(vmem_cap * 0.45), 80 << 20)       # sizing budget for ts
    vmem_limit = min(int(vmem_cap * 0.75), 100 << 20)       # scoped limit with headroom

    p_bytes = 2 * (bk * bk * 2) * 2                         # P1+P2, bf16, double-buffered
    bytes_per_row = (2 + 2 + 2 * 2) * bk * 4                # x/out + T1/T2 streams, f32, dbl-buf
    ts = max(8, (max(vmem_budget - p_bytes, 0) // bytes_per_row) // 8 * 8)
    ts = min(ts, 2048)                                      # diminishing returns past ~2K rows
    ts = min(ts, pl.cdiv(S, 8) * 8)                         # never exceed (rounded-up) S

    n_s = pl.cdiv(S, ts)
    # v7x has 2 TensorCores: make sure the parallel grid has at least 2 steps.
    if B * n_s * n_h < 2 and S > 8:
        ts = max(8, ((pl.cdiv(S, 2) + 7) // 8) * 8)
        n_s = pl.cdiv(S, ts)

    grid = (n_s, B, n_h)   # seq outer / batch middle / head-block inner (T1/T2 reuse)

    out = pl.pallas_call(
        _rope_rotation_kernel,
        out_shape=jax.ShapeDtypeStruct((B, S, n_state), x.dtype),
        grid_spec=pltpu.PrefetchScalarGridSpec(
            num_scalar_prefetch=0,
            grid=grid,
            in_specs=[
                pl.BlockSpec((1, ts, bk), lambda s, b, h: (b, s, h)),   # x
                pl.BlockSpec((bk, bk), lambda s, b, h: (0, 0)),         # P1 (shared)
                pl.BlockSpec((bk, bk), lambda s, b, h: (0, 0)),         # P2 (shared)
                pl.BlockSpec((ts, bk), lambda s, b, h: (s, 0)),         # T1
                pl.BlockSpec((ts, bk), lambda s, b, h: (s, 0)),         # T2
            ],
            out_specs=pl.BlockSpec((1, ts, bk), lambda s, b, h: (b, s, h)),
        ),
        compiler_params=pltpu.CompilerParams(
            dimension_semantics=("parallel", "parallel", "parallel"),
            vmem_limit_bytes=vmem_limit),
    )(x, P1, P2, T1, T2)
    return out


def _reference(x, rotation_matrix, inv_freq, n_head):
    """Pure-JAX f32 replica of the PyTorch RotaryEmbeddingWithRotation._forward."""
    B, S, n_state = x.shape
    h_dim = n_state // n_head
    rot = jnp.matmul(x.reshape(-1, h_dim), rotation_matrix,
                     precision=jax.lax.Precision.HIGHEST).reshape(B, S, n_head, h_dim)
    sinusoid = jnp.arange(S, dtype=jnp.float32)[:, None] * inv_freq[None, :]
    sin = jnp.sin(sinusoid)[None, :, None, :]
    cos = jnp.cos(sinusoid)[None, :, None, :]
    x1, x2 = rot[..., 0::2], rot[..., 1::2]
    out = jnp.concatenate([x1 * cos - x2 * sin, x1 * sin + x2 * cos], axis=-1)
    return out.reshape(B, S, n_state)


if __name__ == "__main__":
    # module config: n_state=32, n_head=4 -> h_dim=8 ; input (B=2, S=8, n_state=32)
    n_state, n_head, base = 32, 4, 10000
    h_dim = n_state // n_head
    B, S = 2, 8

    key = jax.random.PRNGKey(0)
    kx, kr = jax.random.split(key)
    x = jax.random.normal(kx, (B, S, n_state), dtype=jnp.float32)

    # parameters (deterministic, in-script). __init__ uses eye(h_dim); add a small
    # random perturbation so the learned-rotation matmul is non-trivial.
    rotation_matrix = jnp.eye(h_dim, dtype=jnp.float32) + \
        0.1 * jax.random.normal(kr, (h_dim, h_dim), dtype=jnp.float32)
    inv_freq = 1.0 / (base ** (jnp.arange(0, h_dim, 2, dtype=jnp.float32) / h_dim))

    out = rotary_embedding_with_rotation(x, rotation_matrix, inv_freq, n_head)
    out = jax.block_until_ready(out)

    ref = _reference(x, rotation_matrix, inv_freq, n_head)
    # bf16 MXU operands => loosened tolerance vs. the HIGHEST-precision f32 reference.
    np.testing.assert_allclose(np.asarray(out), np.asarray(ref), rtol=5e-2, atol=5e-2)

    print("KERNEL_OK")
</pallas_src>

<mosaic_0001>
module attributes {stable_mosaic.version = 11 : i64} {
  func.func @_rope_rotation_kernel(%arg0: i32, %arg1: i32, %arg2: i32, %arg3: memref<1x8x32xf32, #tpu.memory_space<vmem>>, %arg4: memref<32x32xbf16, #tpu.memory_space<vmem>>, %arg5: memref<32x32xbf16, #tpu.memory_space<vmem>>, %arg6: memref<8x32xf32, #tpu.memory_space<vmem>>, %arg7: memref<8x32xf32, #tpu.memory_space<vmem>>, %arg8: memref<1x8x32xf32, #tpu.memory_space<vmem>>) attributes {dimension_semantics = [#tpu.dimension_semantics<parallel>, #tpu.dimension_semantics<parallel>, #tpu.dimension_semantics<parallel>], iteration_bounds = array<i64: 1, 2, 1>, scalar_prefetch = 0 : i64, scratch_operands = 0 : i64, tpu.core_type = #tpu.core_type<tc>, window_params = [{transform_indices = @transform_0, window_bounds = array<i64: 1, 8, 32>}, {pipeline_mode = #tpu.pipeline_mode<synchronous>, transform_indices = @transform_1, window_bounds = array<i64: 32, 32>}, {pipeline_mode = #tpu.pipeline_mode<synchronous>, transform_indices = @transform_2, window_bounds = array<i64: 32, 32>}, {transform_indices = @transform_3, window_bounds = array<i64: 8, 32>}, {transform_indices = @transform_4, window_bounds = array<i64: 8, 32>}, {transform_indices = @transform_5, window_bounds = array<i64: 1, 8, 32>}]} {
    %c0 = arith.constant 0 : index
    %c0_0 = arith.constant 0 : index
    %c0_1 = arith.constant 0 : index
    %0 = vector.load %arg3[%c0, %c0_0, %c0_1] : memref<1x8x32xf32, #tpu.memory_space<vmem>>, vector<1x8x32xf32>
    %1 = vector.shape_cast %0 : vector<1x8x32xf32> to vector<8x32xf32>
    %2 = arith.truncf %1 : vector<8x32xf32> to vector<8x32xbf16>
    %c0_2 = arith.constant 0 : index
    %c0_3 = arith.constant 0 : index
    %3 = vector.load %arg4[%c0_2, %c0_3] : memref<32x32xbf16, #tpu.memory_space<vmem>>, vector<32x32xbf16>
    %cst = arith.constant dense<0.000000e+00> : vector<8x32xf32>
    %4 = tpu.matmul %2, %3, %cst {dimension_numbers = #tpu.dot_dimension_numbers<[1], [0], [0], [1], [0, 0, 1, 1], [], []>} : vector<8x32xbf16>, vector<32x32xbf16>, vector<8x32xf32> -> vector<8x32xf32>
    %c0_4 = arith.constant 0 : index
    %c0_5 = arith.constant 0 : index
    %5 = vector.load %arg5[%c0_4, %c0_5] : memref<32x32xbf16, #tpu.memory_space<vmem>>, vector<32x32xbf16>
    %cst_6 = arith.constant dense<0.000000e+00> : vector<8x32xf32>
    %6 = tpu.matmul %2, %5, %cst_6 {dimension_numbers = #tpu.dot_dimension_numbers<[1], [0], [0], [1], [0, 0, 1, 1], [], []>} : vector<8x32xbf16>, vector<32x32xbf16>, vector<8x32xf32> -> vector<8x32xf32>
    %c0_7 = arith.constant 0 : index
    %c0_8 = arith.constant 0 : index
    %7 = vector.load %arg6[%c0_7, %c0_8] : memref<8x32xf32, #tpu.memory_space<vmem>>, vector<8x32xf32>
    %8 = arith.mulf %4, %7 : vector<8x32xf32>
    %c0_9 = arith.constant 0 : index
    %c0_10 = arith.constant 0 : index
    %9 = vector.load %arg7[%c0_9, %c0_10] : memref<8x32xf32, #tpu.memory_space<vmem>>, vector<8x32xf32>
    %10 = arith.mulf %6, %9 : vector<8x32xf32>
    %11 = arith.addf %8, %10 : vector<8x32xf32>
    %c0_11 = arith.constant 0 : index
    %c0_12 = arith.constant 0 : index
    %c0_13 = arith.constant 0 : index
    %12 = vector.load %arg8[%c0_11, %c0_12, %c0_13] : memref<1x8x32xf32, #tpu.memory_space<vmem>>, vector<1x8x32xf32>
    %13 = vector.shape_cast %12 : vector<1x8x32xf32> to vector<8x32xf32>
    %14 = vector.shape_cast %11 : vector<8x32xf32> to vector<1x8x32xf32>
    tpu.vector_store %arg8[%c0_11, %c0_12, %c0_13], %14 {strides = array<i32>} : memref<1x8x32xf32, #tpu.memory_space<vmem>>, vector<1x8x32xf32>,
    return
  }
  func.func @transform_0(%arg0: i32, %arg1: i32, %arg2: i32) -> (i32, i32, i32) {
    %c0_i32 = arith.constant 0 : i32
    return %arg1, %arg0, %arg2 : i32, i32, i32
  }
  func.func @transform_1(%arg0: i32, %arg1: i32, %arg2: i32) -> (i32, i32) {
    %c0_i32 = arith.constant 0 : i32
    %c0_i32_0 = arith.constant 0 : i32
    %c0_i32_1 = arith.constant 0 : i32
    return %c0_i32, %c0_i32_0 : i32, i32
  }
  func.func @transform_2(%arg0: i32, %arg1: i32, %arg2: i32) -> (i32, i32) {
    %c0_i32 = arith.constant 0 : i32
    %c0_i32_0 = arith.constant 0 : i32
    %c0_i32_1 = arith.constant 0 : i32
    return %c0_i32, %c0_i32_0 : i32, i32
  }
  func.func @transform_3(%arg0: i32, %arg1: i32, %arg2: i32) -> (i32, i32) {
    %c0_i32 = arith.constant 0 : i32
    %c0_i32_0 = arith.constant 0 : i32
    return %arg0, %c0_i32 : i32, i32
  }
  func.func @transform_4(%arg0: i32, %arg1: i32, %arg2: i32) -> (i32, i32) {
    %c0_i32 = arith.constant 0 : i32
    %c0_i32_0 = arith.constant 0 : i32
    return %arg0, %c0_i32 : i32, i32
  }
  func.func @transform_5(%arg0: i32, %arg1: i32, %arg2: i32) -> (i32, i32, i32) {
    %c0_i32 = arith.constant 0 : i32
    return %arg1, %arg0, %arg2 : i32, i32, i32
  }
}

</mosaic_0001>

<bundles_post_ra>
// kernel: tpu_custom_call.1
= control target key start
LH: loop header
LB: loop body
LE: loop exit
PB: predicated region body
PF: predicated region fallthrough
CT: control target
= control target key end

     0   :  { %s1242_s0 = inlined_call_operand.hbm [shape: f32[2,8,32], index: 0, kind: input, shape index: {}]   ;;  %s1243_s1 = inlined_call_operand.hbm [shape: bf16[32,32], index: 1, kind: input, shape index: {}]   ;;  %s1244_s2 = inlined_call_operand.hbm [shape: bf16[32,32], index: 2, kind: input, shape index: {}]   ;;  %s1245_s3 = inlined_call_operand.hbm [shape: f32[8,32], index: 3, kind: input, shape index: {}]   ;;  %s1246_s4 = inlined_call_operand.hbm [shape: f32[8,32], index: 4, kind: input, shape index: {}]   ;;  %s1247_s5 = inlined_call_operand.hbm [shape: f32[2,8,32], index: 5, kind: output, shape index: {}]  }
   0x1   :  { %1249 = sst [smem:[#allocation16_spill]] %s1243_s1 }
   0x2   :  { %1250 = sst [smem:[#allocation17_spill]] %s1244_s2 }
   0x3   :  { %10 = vsyncpa [#allocation3], 0 }
   0x4   :  { %12 = vsyncpa [#allocation3 + $0x1], 0 }
   0x5   :  { %13 = vsyncpa [#allocation6], 0 }
   0x6   :  { %14 = vsyncpa [#allocation9], 0 }
   0x7   :  { %15 = vsyncpa [#allocation4], 0 }
   0x8   :  { %17 = vsyncpa [#allocation4 + $0x1], 0  ;;  %s1027_s18 = smov 0   ;;  %s1029_s19 = smov 0  }
   0x9   :  { %s1031_s20 = smov 0   ;;  %s1033_s21 = smov 0  }
   0xa   :  { %s1035_s22 = smov 0   ;;  %s1037_s23 = smov 0  }
   0xb LB: > { %s605_s24 = sadd.s32 4294967295, %s985_s23   ;;  %p607_p0 = scmp.ge.s32.totalorder %s985_s23, 1  ;;  %s985_s23 = sphi %s1037_s23, %s23_s23   ;;  %s981_s22 = sphi %s1035_s22, %s1267_s22   ;;  %s977_s21 = sphi %s1033_s21, %s1266_s21   ;;  %s973_s20 = sphi %s1031_s20, %s1265_s20   ;;  %s969_s19 = sphi %s1029_s19, %s1264_s19   ;;  %s965_s18 = sphi %s1027_s18, %s1263_s18  }
   0xc   : > { %p1061_p1 = scmp.eq.s32.totalorder %s605_s24, 0  ;;  %p201_p2 = scmp.lt.s32.totalorder %s985_s23, 3 }
   0xd   : > { %s987_s27 = smov [#allocation5]   ;;  %s988_s30 = smov [#allocation8]  }
   0xe   : > { %p1066_p3 = pnand %p607_p0, %p201_p2  ;;  %s213_s28 = sshll.u32 %s987_s27, 4  ;;  %s214_s28 = int_to_ptr.vmem [resolvable:$true] %s213_s28 }
   0xf   : > { %s242_s6 = sshll.u32 %s988_s30, 4  ;;  %s989_s7 = smov [#allocation7]   ;;  %s243_s6 = int_to_ptr.vmem [resolvable:$true] %s242_s6 }
  0x10   : > { %s1252_s26 = scalar_select %p1066_p3, 1, 0 }
  0x11   : > { %p674_p4 = pneg %p1066_p3  ;;  %s226_s8 = sshll.u32 %s989_s7, 4  ;;  %s227_s8 = int_to_ptr.vmem [resolvable:$true] %s226_s8 }
  0x12   : > { %s776_s9 = scalar_lea.vmem %s214_s28, 256  ;;  %p784_p11 = scmp.lt.s32.totalorder %s214_s28, %s214_s28 }
  0x13   : > { %p1075_p6 = pnand %p674_p4, %p1061_p1  ;;  %p777_p8 = scmp.ne.s32.totalorder %s214_s28, %s776_s9 }
  0x14   : > { %p785_p12 = scmp.lt.s32.totalorder %s776_s9, %s776_s9 }
  0x15   : > { %p767_p7 = pneg %p1075_p6 }
  0x16   : > { %p786_p13 = por %p785_p12, %p784_p11 }
  0x17   : > { %p779_p9 = pnand %p777_p8, %p767_p7 }
  0x19   : > { %p780_p10 = pneg %p779_p9 }
  0x1b   : > { %p787_p0 = pnand %p786_p13, %p780_p10 }
  0x1d   : > { %790 = shalt.err (!%p787_p0)
}
  0x1e   : > { %s990_s10 = smov 64   ;;  %s991_s11 = smov 4  }
  0x1f   : > { %s1254_s1 = sld [smem:[#allocation16_spill]]  ;;  %s802_s14 = scalar_lea.vmem %s243_s6, 128 }
  0x20   : > { %p803_p2 = scmp.ne.s32.totalorder %s243_s6, %s802_s14  ;;  %p810_p9 = scmp.lt.s32.totalorder %s243_s6, %s243_s6 }
  0x21   : > { %p811_p5 = scmp.lt.s32.totalorder %s802_s14, %s802_s14 }
  0x22   : > { %p805_p4 = pnand %p803_p2, %p767_p7 }
  0x23   : > { %p812_p11 = por %p811_p5, %p810_p9 }
  0x24   : > { %p806_p8 = pneg %p805_p4 }
  0x25   : > { %677 = dma.hbm_to_vmem [thread:$0]  (!%p1075_p6), %s1254_s1, 256, %s214_s28, [#allocation6], %s990_s10, %s990_s10, %s991_s11  }
  0x26   : > { %p813_p10 = pnand %p812_p11, %p806_p8 }
  0x28   : > { %816 = shalt.err (!%p813_p10)
}
  0x29   : > { %683 = dma.hbm_to_vmem [thread:$0]  (!%p1075_p6), %s1245_s3, 128, %s243_s6, [#allocation9]  }
  0x2a   : > { %s828_s17 = scalar_lea.vmem %s227_s8, 256  ;;  %p836_p2 = scmp.lt.s32.totalorder %s227_s8, %s227_s8 }
  0x2b   : > { %p829_p12 = scmp.ne.s32.totalorder %s227_s8, %s828_s17  ;;  %p837_p4 = scmp.lt.s32.totalorder %s828_s17, %s828_s17 }
  0x2d   : > { %p831_p13 = pnand %p829_p12, %p767_p7  ;;  %p838_p3 = por %p837_p4, %p836_p2 }
  0x2f   : > { %p832_p0 = pneg %p831_p13 }
  0x31   : > { %p839_p5 = pnand %p838_p3, %p832_p0 }
  0x33   : > { %842 = shalt.err (!%p839_p5)
}
  0x34   : > { %s1255_s2 = sld [smem:[#allocation17_spill]]  ;;  %s992_s30 = smov [#allocation10]  }
  0x35   : > { %s255_s6 = sshll.u32 %s992_s30, 4  ;;  %s256_s6 = int_to_ptr.vmem [resolvable:$true] %s255_s6 }
  0x36   : > { %s854_s7 = scalar_lea.vmem %s256_s6, 128  ;;  %p862_p10 = scmp.lt.s32.totalorder %s256_s6, %s256_s6 }
  0x37   : > { %p855_p8 = scmp.ne.s32.totalorder %s256_s6, %s854_s7  ;;  %p863_p12 = scmp.lt.s32.totalorder %s854_s7, %s854_s7 }
  0x39   : > { %p857_p9 = pnand %p855_p8, %p767_p7  ;;  %p864_p3 = por %p863_p12, %p862_p10 }
  0x3a   : > { %680 = dma.hbm_to_vmem [thread:$0]  (!%p1075_p6), %s1255_s2, 256, %s227_s8, [#allocation6], %s990_s10, %s990_s10, %s991_s11  }
  0x3b   : > { %p858_p11 = pneg %p857_p9 }
  0x3d   : > { %p865_p13 = pnand %p864_p3, %p858_p11 }
  0x3f   : > { %868 = shalt.err (!%p865_p13)
}
  0x40   : > { %686 = dma.hbm_to_vmem [thread:$0]  (!%p1075_p6), %s1246_s4, 128, %s256_s6, [#allocation9]  }
  0x41   : > { %s606_s8 = sadd.s32 4294967294, %s985_s23   ;;  %s38_s10 = sadd.s32 1, %s981_s22 }
  0x42   : > { %p40_p7 = scmp.ge.s32.totalorder %s38_s10, 2  ;;  %s53_s29 = sadd.s32 1, %s973_s20 }
  0x43   : > { %p60_p0 = scmp.ne.s32.totalorder %s973_s20, %s969_s19  ;;  %p61_p2 = scmp.eq.s32.totalorder %s985_s23, 0 }
  0x44   : > { %s1269_s10 = smov (%p40_p7, %s38_s10), 0  ;;  %p66_p5 = scmp.ne.s32.totalorder %s969_s19, %s965_s18 }
  0x45   : > { %p1121_p4 = por %p61_p2, %p60_p0  ;;  %s46_s13 = ssub.s32 %s981_s22, %s1269_s10 }
  0x46   : > { %p188_p6 = scmp.eq.s32.totalorder %s605_s24, 1  ;;  %p51_p8 = scmp.eq.s32.totalorder %s46_s13, 0 }
  0x47   : > { %p1133_p9 = por %p1061_p1, %p66_p5  ;;  %p194_p10 = scmp.eq.s32.totalorder %s606_s8, 1 }
  0x48   : > { %p1137_p11 = por %p188_p6, %p60_p0  ;;  %p699_p3 = scmp.lt.s32.totalorder %s985_s23, 2 }
  0x49   : > { %s1142_s16 = scalar_select %p51_p8, %s973_s20, %s53_s29  }
  0x4a   : > { %p1144_p12 = por %p194_p10, %p66_p5  ;;  %s266_s27 = sand.u32 1, %s973_s20  }
  0x4b   : > { %s614_s24 = sshll.u32 %s981_s22, 7  ;;  %s613_s28 = sshll.u32 %s266_s27, 3 }
  0x4c   : > { %s277_s7 = scalar_lea.hbm %s1242_s0, %s614_s24  ;;  %s270_s9 = scalar_lea.vmem [#allocation2], %s613_s28 }
  0x4d   : > { %s279_s12 = sshll.u32 %s270_s9, 4  ;;  %p1156_p13 = pnand %p699_p3, %p1121_p4  ;;  %s280_s12 = int_to_ptr.vmem [resolvable:$true] %s279_s12 }
  0x4e   : > { %s267_s8 = scalar_lea.sflag [#allocation3], %s266_s27  ;;  %s882_s29 = scalar_lea.vmem %s280_s12, 128 }
  0x4f   : > { %p871_p7 = pneg %p1156_p13  ;;  %p883_p0 = scmp.ne.s32.totalorder %s280_s12, %s882_s29 }
  0x50   : > { %s993_s1 = smov [#allocation2]  }
  0x51   : > { %p885_p2 = pnand %p883_p0, %p871_p7  ;;  %s887_s2 = sshll.u32 %s993_s1, 4  ;;  %s888_s2 = int_to_ptr.vmem [resolvable:$false] %s887_s2 }
  0x52   : > { %s889_s24 = scalar_lea.vmem %s888_s2, 256  ;;  %p890_p6 = scmp.lt.s32.totalorder %s280_s12, %s888_s2 }
  0x53   : > { %p886_p5 = pneg %p885_p2  ;;  %p891_p8 = scmp.lt.s32.totalorder %s889_s24, %s882_s29 }
  0x55   : > { %p892_p10 = por %p891_p8, %p890_p6 }
  0x57   : > { %p893_p4 = pnand %p892_p10, %p886_p5 }
  0x59   : > { %896 = shalt.err (!%p893_p4)
}
  0x5a   : > { %690 = dma.hbm_to_vmem [thread:$0]  (!%p1156_p13), %s277_s7, 128, %s280_s12, %s267_s8  }
  0x5b   : > { %p1261_p3 = scmp.ne.s32.totalorder %s1252_s26, 0 }
  0x5c   : > { %s1167_s11 = sand.u32 (!%p1261_p3), 1, %s969_s19  }
  0x5d   : > { %288 = sbr.rel (%p1261_p3) target bundleno = 324 (0x144), region = 40  ;;  %s616_s1 = sshll.u32 (!%p1261_p3), %s1167_s11, 3 }
  0x5e   : > { %s291_s27 = scalar_lea.sflag (!%p1261_p3), [#allocation3], %s1167_s11  ;;  %s294_s2 = scalar_lea.vmem (!%p1261_p3), [#allocation2], %s616_s1 }
  0x62   : > { %948 = dma.done.wait (%p1133_p9), %s291_s27, 128  }
  0x63   : > { %950 = vsyncadd (%p1133_p9), %s291_s27, 4294967168 }
  0x64   : > { %952 = dma.done.wait (%p1061_p1), [#allocation6], 512  }
  0x65   : > { %954 = vsyncadd (%p1061_p1), [#allocation6], 4294966784 }
  0x66   : > { %956 = dma.done.wait (%p1061_p1), [#allocation9], 256  }
  0x67   : > { %958 = vsyncadd (%p1061_p1), [#allocation9], 4294967040  ;;  %v994_v0 = vmov 0.0   ;;  %vm995_vm0 = vmmov 0   ;;  %v761_v1 = vld [vmem:[#allocation5 + $0x8] sm:$0xff]   ;;  %v762_v2 = vld [vmem:[#allocation7 + $0x8] sm:$0xff]  }
  0x68   : > { %638 = vmatprep.subr.bf16.mxu0 %v994_v0  ;;  %646 = vmatprep.subr.bf16.mxu1 %v994_v0  ;;  %v763_v3 = vld [vmem:[#allocation5] sm:$0xff]   ;;  %v764_v4 = vld [vmem:[#allocation7] sm:$0xff]   ;;  %vm356_vm1 = vcmask 261120   ;;  %v458_v8 = vld [vmem:[#allocation10] sm:$0xff]  ;;  %s629_s25 = sshll.u32 %s977_s21, 7  ;;  %s336_s26 = scalar_lea.vmem [#allocation11], %s616_s1 }
  0x69   : > { %642 = vmatprep.mubr.msk.bf16.mxu0 %vm995_vm0, %v994_v0  ;;  %650 = vmatprep.mubr.msk.bf16.mxu1 %vm995_vm0, %v994_v0  ;;  %v338_v5 = vld [vmem:[%s294_s2] sm:$0xff]  ;;  %v456_v7 = vld [vmem:[#allocation8] sm:$0xff]  ;;  %s478_s14 = sshll.u32 %s336_s26, 4  ;;  %s1193_s6 = scalar_lea.hbm %s1247_s5, %s629_s25  ;;  %s1195_s14 = int_to_ptr.vmem [resolvable:$true] %s478_s14 }
  0x6a   : > { %639 = vmatpush3.bf16.msra.mxu0 %v761_v1  ;;  %647 = vmatpush3.bf16.msra.mxu1 %v762_v2  ;;  %v339_v6 = vpack.c.bf16 %v338_v5, %v338_v5  ;;  %s463_s21 = scalar_lea.sflag [#allocation4], %s1167_s11  ;;  %s897_s7 = scalar_lea.vmem %s1195_s14, 128 }
  0x6b   : > { %640 = vmatprep.subr.bf16.mxu0 %v994_v0  ;;  %648 = vmatprep.subr.bf16.mxu1 %v994_v0  ;;  %p898_p1 = scmp.ne.s32.totalorder %s1195_s14, %s897_s7  ;;  %s996_s9 = smov [#allocation11]  }
  0x6c   : > { %s901_s12 = sshll.u32 %s996_s9, 4  ;;  %s902_s12 = int_to_ptr.vmem [resolvable:$false] %s901_s12 }
  0x6d   : > { %p899_p9 = pnand %p898_p1, %p1137_p11  ;;  %s903_s13 = scalar_lea.vmem %s902_s12, 256 }
  0x6e   : > { %641 = vmatpush3.bf16.msra.mxu0 %v763_v3  ;;  %649 = vmatpush3.bf16.msra.mxu1 %v764_v4  ;;  %p904_p7 = scmp.lt.s32.totalorder %s1195_s14, %s902_s12  ;;  %p905_p0 = scmp.lt.s32.totalorder %s903_s13, %s897_s7 }
  0x6f   : > { %p900_p13 = pneg %p899_p9 }
  0x70   : > { %p906_p2 = por %p905_p0, %p904_p7 }
  0x71   : > { %643 = vmatmul.mubr.msk.bf16.vlgmr.msra.gmra.mxu0 %vm356_vm1, %v339_v6  ;;  %651 = vmatmul.mubr.msk.bf16.vlgmr.msra.gmra.mxu1 %vm356_vm1, %v339_v6 }
  0x72   : > { %p907_p5 = pnand %p906_p2, %p900_p13 }
 0x131   : > { %v394_v9 = vpop.f32.mrf.mxu0  ;;  %v450_v11 = vpop.f32.mrf.mxu1 }
 0x132   : > { %v457_v10 = vmul.f32 %v456_v7, %v394_v9  ;;  %v459_v12 = vmul.f32 %v458_v8, %v450_v11 }
 0x133   : > { %v644_v13 = vpop.f32.mrf.mxu0  ;;  %v652_v14 = vpop.f32.mrf.mxu1 }
 0x134   : > { %v460_v15 = vadd.f32 %v459_v12, %v457_v10 }
 0x135   : > { %v397_v16 = vpop.f32.mrf.mxu0  ;;  %v453_v17 = vpop.f32.mrf.mxu1 }
 0x136   : > { %461 = vst.msk [vmem:[%s336_s26] sm:$0xff] %vm356_vm1, %v460_v15 }
 0x137   : > { %v645_v18 = vpop.f32.mrf.mxu0  ;;  %v653_v19 = vpop.f32.mrf.mxu1 }
 0x138   : > { %910 = shalt.err (!%p907_p5)
}
 0x139   : > { %s911_s8 = scalar_lea.hbm %s1193_s6, 128  ;;  %s915_s11 = scalar_lea.hbm %s1247_s5, 256 }
 0x13a   : > { %p912_p6 = scmp.ne.s32.totalorder %s1193_s6, %s911_s8  ;;  %p916_p4 = scmp.lt.s32.totalorder %s1193_s6, %s1247_s5 }
 0x13b   : > { %p917_p3 = scmp.lt.s32.totalorder %s915_s11, %s911_s8 }
 0x13c   : > { %p913_p8 = pnand %p912_p6, %p1137_p11 }
 0x13d   : > { %p918_p1 = por %p917_p3, %p916_p4 }
 0x13e   : > { %p914_p10 = pneg %p913_p8 }
 0x140   : > { %p919_p9 = pnand %p918_p1, %p914_p10 }
 0x142   : > { %922 = shalt.err (!%p919_p9)
}
 0x143   : > { %672 = dma.vmem_to_hbm [thread:$0]  (%p1137_p11), %s1195_s14, 128, %s1193_s6, %s463_s21  }
 0x144 PF: > { %s490_s2 = sand.u32 1, %s965_s18   ;;  %p1262_p13 = scmp.ge.s32.totalorder %s985_s23, 2 }
 0x145   : > { %s491_s25 = scalar_lea.sflag [#allocation4], %s490_s2 }
 0x146   : > { %p692_p7 = pnand %p1262_p13, %p1144_p12 }
 0x148   : > { %p693_p0 = pneg %p692_p7 }
 0x14a   : > { %960 = dma.done.wait (%p693_p0), %s491_s25, 128  }
 0x14b   : > { %962 = vsyncadd (%p693_p0), %s491_s25, 4294967168  ;;  %s23_s23 = sadd.s32 1, %s985_s23   ;;  %s1263_s18 = smov %s969_s19 }
 0x14c   : > { %p20_p2 = scmp.ge.s32.totalorder %s23_s23, 4   ;;  %s1264_s19 = smov %s973_s20 }
 0x14d   : > { %s1265_s20 = smov %s1142_s16  ;;  %s1266_s21 = smov %s981_s22 }
 0x14e   : > { %s1267_s22 = smov %s1269_s10  ;;  %22 = sbr.rel (!%p20_p2) target bundleno = 11 (0xb), region = 103 }
 0x153   :  { %496 = vsyncpa [#allocation3], 1 }
 0x154   :  { %498 = vsyncpa [#allocation3 + $0x1], 1 }
 0x155   :  { %499 = vsyncpa [#allocation6], 1 }
 0x156   :  { %500 = vsyncpa [#allocation9], 1 }
 0x157   :  { %501 = vsyncpa [#allocation4], 1 }
 0x158   :  { %503 = vsyncpa [#allocation4 + $0x1], 1 }

</bundles_post_ra>
